<compile_context>
chip_gen: v7x
topology: tpu7x:2x2x1
jax: 0.10.0
libtpu: 0.0.40
codegen_flags: <defaults>
</compile_context>

<pallas_src>
import jax
import jax.numpy as jnp
from jax.experimental import pallas as pl
from jax.experimental.pallas import tpu as pltpu

LANE = 128


def _round_up(x, m):
    return ((x + m - 1) // m) * m


def _combined_classifier_kernel(emb_ref, num_ref, w1e_ref, w1n_ref, b1_ref,
                                w2_ref, b2_ref, w3_ref, b3_ref, out_ref):
    """Fused MLP on one batch tile.

    concat is fused as two MXU matmuls against the split W1; all matmuls run in
    bf16 with f32 accumulation; bias adds / ReLU stay in f32 (VPU). Dropout(0.2)
    is identity at inference time. Logits are stored bf16, lane-dense (128 wide).
    """
    # If the caller already provides bf16 activations these casts are no-ops.
    emb = emb_ref[...].astype(jnp.bfloat16)          # (bb, E)
    num = num_ref[...].astype(jnp.bfloat16)          # (bb, N)

    # Layer 1: Linear(E+N, 256) + ReLU, concat fused as a split dot.
    h1 = jnp.dot(emb, w1e_ref[...], preferred_element_type=jnp.float32)
    h1 = h1 + jnp.dot(num, w1n_ref[...], preferred_element_type=jnp.float32)
    h1 = jnp.maximum(h1 + b1_ref[...], 0.0)          # (bb, 256) f32

    # Layer 2: Linear(256, 128) + ReLU.
    h2 = jnp.dot(h1.astype(jnp.bfloat16), w2_ref[...],
                 preferred_element_type=jnp.float32)
    h2 = jnp.maximum(h2 + b2_ref[...], 0.0)          # (bb, 128) f32

    # Layer 3: Linear(128, num_classes) -- output padded to 128 lanes.
    out = jnp.dot(h2.astype(jnp.bfloat16), w3_ref[...],
                  preferred_element_type=jnp.float32)
    out = out + b3_ref[...]                          # (bb, 128) f32

    out_ref[...] = out.astype(out_ref.dtype)         # bf16 lane-dense store


def _choose_block_b(batch, block_b):
    """Pick the batch tile.

    Small batches: a single block equal to the full batch (always a legal block
    shape, no padding needed). Large batches: cap at block_b but keep at least
    4 grid steps so both v7x TensorCores get multiple tiles and the pipeline has
    work to overlap; never shrink below 512 rows (HBM-roofline sweet spot).
    """
    if batch <= block_b:
        return batch
    bb = block_b
    while bb > 512 and pl.cdiv(batch, bb) < 4:
        bb //= 2
    return bb


def combined_classifier_forward(emb, numeric, params, num_classes, *,
                                block_b=1024):
    """emb: (B, E), numeric: (B, N) -> logits (B, num_classes) f32."""
    w1e, w1n, b1, w2, b2, w3p, b3p = params
    batch, e_dim = emb.shape
    n_dim = numeric.shape[1]
    out_pad = w3p.shape[1]                           # num_classes padded to 128

    bb = _choose_block_b(batch, block_b)
    grid = (pl.cdiv(batch, bb),)                     # ragged last block OK

    # Activations stream per batch tile; weights/biases stay VMEM-resident
    # (constant block index -> fetched once across the whole grid).
    batch_spec = lambda cols: pl.BlockSpec((bb, cols), lambda i: (i, 0))
    const_spec = lambda a: pl.BlockSpec(a.shape, lambda i: (0,) * a.ndim)

    out = pl.pallas_call(
        _combined_classifier_kernel,
        out_shape=jax.ShapeDtypeStruct((batch, out_pad), jnp.bfloat16),
        grid=grid,
        in_specs=[
            batch_spec(e_dim),          # emb
            batch_spec(n_dim),          # numeric
            const_spec(w1e), const_spec(w1n), const_spec(b1),
            const_spec(w2), const_spec(b2),
            const_spec(w3p), const_spec(b3p),
        ],
        out_specs=pl.BlockSpec((bb, out_pad), lambda i: (i, 0)),
        compiler_params=pltpu.CompilerParams(
            dimension_semantics=("parallel",)),
    )(emb, numeric, w1e, w1n, b1, w2, b2, w3p, b3p)

    # Slice off padded class columns, then cast bf16 logits back to f32.
    return out[:, :num_classes].astype(jnp.float32)


def init_params(key, embedding_dim, numeric_dim, num_classes):
    """nn.Linear-style init (uniform +/- 1/sqrt(fan_in)).

    Returns (kernel_params, f32_params). Kernel weights are [in, out]
    (transposed vs PyTorch) in bf16 for the MXU; W1 is pre-split along its
    input dim (emb | numeric) so the concat is fused; W3/b3 are zero-padded to
    a 128-wide lane dim. f32_params are the unquantized originals for the
    non-circular reference check.
    """
    d_in = embedding_dim + numeric_dim
    dims = [(d_in, 256), (256, 128), (128, num_classes)]
    raw = []
    for fan_in, fan_out in dims:
        key, kw, kb = jax.random.split(key, 3)
        bound = 1.0 / jnp.sqrt(fan_in)
        w = jax.random.uniform(kw, (fan_in, fan_out), jnp.float32, -bound, bound)
        b = jax.random.uniform(kb, (1, fan_out), jnp.float32, -bound, bound)
        raw.append((w, b))

    (w1, b1), (w2, b2), (w3, b3) = raw
    out_pad = _round_up(num_classes, LANE)

    w1e = w1[:embedding_dim, :].astype(jnp.bfloat16)
    w1n = w1[embedding_dim:, :].astype(jnp.bfloat16)
    w2b = w2.astype(jnp.bfloat16)
    w3p = jnp.pad(w3, ((0, 0), (0, out_pad - num_classes))).astype(jnp.bfloat16)
    b3p = jnp.pad(b3, ((0, 0), (0, out_pad - num_classes)))  # f32

    kernel_params = (w1e, w1n, b1, w2b, b2, w3p, b3p)  # biases stay f32
    f32_params = (w1, b1, w2, b2, w3, b3)
    return kernel_params, f32_params


def _reference_forward_bf16(emb, numeric, params, num_classes):
    """Plain-JAX reference using the same bf16 weights / bf16 logit store."""
    w1e, w1n, b1, w2, b2, w3p, b3p = params
    h1 = jnp.dot(emb.astype(jnp.bfloat16), w1e, preferred_element_type=jnp.float32)
    h1 = h1 + jnp.dot(numeric.astype(jnp.bfloat16), w1n,
                      preferred_element_type=jnp.float32)
    h1 = jnp.maximum(h1 + b1, 0.0)
    h2 = jnp.dot(h1.astype(jnp.bfloat16), w2, preferred_element_type=jnp.float32)
    h2 = jnp.maximum(h2 + b2, 0.0)
    out = jnp.dot(h2.astype(jnp.bfloat16), w3p, preferred_element_type=jnp.float32)
    out = (out + b3p).astype(jnp.bfloat16).astype(jnp.float32)
    return out[:, :num_classes]


def _reference_forward_f32(emb, numeric, f32_params):
    """Pure-f32 reference against the original (unquantized) weights."""
    w1, b1, w2, b2, w3, b3 = f32_params
    x = jnp.concatenate([emb, numeric], axis=1)
    h1 = jnp.maximum(x @ w1 + b1, 0.0)
    h2 = jnp.maximum(h1 @ w2 + b2, 0.0)
    return h2 @ w3 + b3


if __name__ == "__main__":
    batch = 8
    embedding_dim = 32
    numeric_dim = 8
    num_classes = 10

    key = jax.random.PRNGKey(0)
    k_emb, k_num, k_par = jax.random.split(key, 3)

    emb = jax.random.normal(k_emb, (batch, embedding_dim), jnp.float32)
    numeric = jax.random.normal(k_num, (batch, numeric_dim), jnp.float32)
    kernel_params, f32_params = init_params(
        k_par, embedding_dim, numeric_dim, num_classes)

    # TODO(synk): Dropout(0.2) has no effect in eval/inference mode, so it is
    # implemented as identity (training-mode stochastic dropout not included).
    out = combined_classifier_forward(emb, numeric, kernel_params, num_classes)
    jax.block_until_ready(out)

    assert out.shape == (batch, num_classes), out.shape
    assert out.dtype == jnp.float32, out.dtype

    # Tight check vs an identically-quantized (bf16-weight) reference.
    ref_bf16 = _reference_forward_bf16(emb, numeric, kernel_params, num_classes)
    assert jnp.allclose(out, ref_bf16, atol=5e-2, rtol=5e-2), \
        "mismatch vs bf16 reference"

    # Non-circular check vs the pure-f32 reference (bounds bf16 quant error).
    ref_f32 = _reference_forward_f32(emb, numeric, f32_params)
    assert jnp.allclose(out, ref_f32, atol=1.5e-1, rtol=1.5e-1), \
        "mismatch vs f32 reference"

    print("KERNEL_OK")
</pallas_src>

<mosaic_0001>
module attributes {stable_mosaic.version = 11 : i64} {
  func.func @_combined_classifier_kernel(%arg0: i32, %arg1: memref<8x32xf32, #tpu.memory_space<vmem>>, %arg2: memref<8x8xf32, #tpu.memory_space<vmem>>, %arg3: memref<32x256xbf16, #tpu.memory_space<vmem>>, %arg4: memref<8x256xbf16, #tpu.memory_space<vmem>>, %arg5: memref<1x256xf32, #tpu.memory_space<vmem>>, %arg6: memref<256x128xbf16, #tpu.memory_space<vmem>>, %arg7: memref<1x128xf32, #tpu.memory_space<vmem>>, %arg8: memref<128x128xbf16, #tpu.memory_space<vmem>>, %arg9: memref<1x128xf32, #tpu.memory_space<vmem>>, %arg10: memref<8x128xbf16, #tpu.memory_space<vmem>>) attributes {dimension_semantics = [#tpu.dimension_semantics<parallel>], iteration_bounds = array<i64: 1>, scalar_prefetch = 0 : i64, scratch_operands = 0 : i64, tpu.core_type = #tpu.core_type<tc>, window_params = [{transform_indices = @transform_0, window_bounds = array<i64: 8, 32>}, {transform_indices = @transform_1, window_bounds = array<i64: 8, 8>}, {pipeline_mode = #tpu.pipeline_mode<synchronous>, transform_indices = @transform_2, window_bounds = array<i64: 32, 256>}, {pipeline_mode = #tpu.pipeline_mode<synchronous>, transform_indices = @transform_3, window_bounds = array<i64: 8, 256>}, {pipeline_mode = #tpu.pipeline_mode<synchronous>, transform_indices = @transform_4, window_bounds = array<i64: 1, 256>}, {pipeline_mode = #tpu.pipeline_mode<synchronous>, transform_indices = @transform_5, window_bounds = array<i64: 256, 128>}, {pipeline_mode = #tpu.pipeline_mode<synchronous>, transform_indices = @transform_6, window_bounds = array<i64: 1, 128>}, {pipeline_mode = #tpu.pipeline_mode<synchronous>, transform_indices = @transform_7, window_bounds = array<i64: 128, 128>}, {pipeline_mode = #tpu.pipeline_mode<synchronous>, transform_indices = @transform_8, window_bounds = array<i64: 1, 128>}, {transform_indices = @transform_9, window_bounds = array<i64: 8, 128>}]} {
    %c0 = arith.constant 0 : index
    %c0_0 = arith.constant 0 : index
    %0 = vector.load %arg1[%c0, %c0_0] : memref<8x32xf32, #tpu.memory_space<vmem>>, vector<8x32xf32>
    %1 = arith.truncf %0 : vector<8x32xf32> to vector<8x32xbf16>
    %c0_1 = arith.constant 0 : index
    %c0_2 = arith.constant 0 : index
    %2 = vector.load %arg2[%c0_1, %c0_2] : memref<8x8xf32, #tpu.memory_space<vmem>>, vector<8x8xf32>
    %3 = arith.truncf %2 : vector<8x8xf32> to vector<8x8xbf16>
    %c0_3 = arith.constant 0 : index
    %c0_4 = arith.constant 0 : index
    %4 = vector.load %arg3[%c0_3, %c0_4] : memref<32x256xbf16, #tpu.memory_space<vmem>>, vector<32x256xbf16>
    %cst = arith.constant dense<0.000000e+00> : vector<8x256xf32>
    %5 = tpu.matmul %1, %4, %cst {dimension_numbers = #tpu.dot_dimension_numbers<[1], [0], [0], [1], [0, 0, 1, 1], [], []>} : vector<8x32xbf16>, vector<32x256xbf16>, vector<8x256xf32> -> vector<8x256xf32>
    %c0_5 = arith.constant 0 : index
    %c0_6 = arith.constant 0 : index
    %6 = vector.load %arg4[%c0_5, %c0_6] : memref<8x256xbf16, #tpu.memory_space<vmem>>, vector<8x256xbf16>
    %cst_7 = arith.constant dense<0.000000e+00> : vector<8x256xf32>
    %7 = tpu.matmul %3, %6, %cst_7 {dimension_numbers = #tpu.dot_dimension_numbers<[1], [0], [0], [1], [0, 0, 1, 1], [], []>} : vector<8x8xbf16>, vector<8x256xbf16>, vector<8x256xf32> -> vector<8x256xf32>
    %8 = arith.addf %5, %7 : vector<8x256xf32>
    %c0_8 = arith.constant 0 : index
    %c0_9 = arith.constant 0 : index
    %9 = vector.load %arg5[%c0_8, %c0_9] : memref<1x256xf32, #tpu.memory_space<vmem>>, vector<1x256xf32>
    %10 = vector.broadcast %9 : vector<1x256xf32> to vector<8x256xf32>
    %11 = arith.addf %8, %10 : vector<8x256xf32>
    %cst_10 = arith.constant 0.000000e+00 : f32
    %12 = vector.broadcast %cst_10 : f32 to vector<8x256xf32>
    %13 = arith.maximumf %11, %12 : vector<8x256xf32>
    %14 = arith.truncf %13 : vector<8x256xf32> to vector<8x256xbf16>
    %c0_11 = arith.constant 0 : index
    %c0_12 = arith.constant 0 : index
    %15 = vector.load %arg6[%c0_11, %c0_12] : memref<256x128xbf16, #tpu.memory_space<vmem>>, vector<256x128xbf16>
    %cst_13 = arith.constant dense<0.000000e+00> : vector<8x128xf32>
    %16 = tpu.matmul %14, %15, %cst_13 {dimension_numbers = #tpu.dot_dimension_numbers<[1], [0], [0], [1], [0, 0, 1, 1], [], []>} : vector<8x256xbf16>, vector<256x128xbf16>, vector<8x128xf32> -> vector<8x128xf32>
    %c0_14 = arith.constant 0 : index
    %c0_15 = arith.constant 0 : index
    %17 = vector.load %arg7[%c0_14, %c0_15] : memref<1x128xf32, #tpu.memory_space<vmem>>, vector<1x128xf32>
    %18 = vector.broadcast %17 : vector<1x128xf32> to vector<8x128xf32>
    %19 = arith.addf %16, %18 : vector<8x128xf32>
    %cst_16 = arith.constant 0.000000e+00 : f32
    %20 = vector.broadcast %cst_16 : f32 to vector<8x128xf32>
    %21 = arith.maximumf %19, %20 : vector<8x128xf32>
    %22 = arith.truncf %21 : vector<8x128xf32> to vector<8x128xbf16>
    %c0_17 = arith.constant 0 : index
    %c0_18 = arith.constant 0 : index
    %23 = vector.load %arg8[%c0_17, %c0_18] : memref<128x128xbf16, #tpu.memory_space<vmem>>, vector<128x128xbf16>
    %cst_19 = arith.constant dense<0.000000e+00> : vector<8x128xf32>
    %24 = tpu.matmul %22, %23, %cst_19 {dimension_numbers = #tpu.dot_dimension_numbers<[1], [0], [0], [1], [0, 0, 1, 1], [], []>} : vector<8x128xbf16>, vector<128x128xbf16>, vector<8x128xf32> -> vector<8x128xf32>
    %c0_20 = arith.constant 0 : index
    %c0_21 = arith.constant 0 : index
    %25 = vector.load %arg9[%c0_20, %c0_21] : memref<1x128xf32, #tpu.memory_space<vmem>>, vector<1x128xf32>
    %26 = vector.broadcast %25 : vector<1x128xf32> to vector<8x128xf32>
    %27 = arith.addf %24, %26 : vector<8x128xf32>
    %28 = arith.truncf %27 : vector<8x128xf32> to vector<8x128xbf16>
    %c0_22 = arith.constant 0 : index
    %c0_23 = arith.constant 0 : index
    %29 = vector.load %arg10[%c0_22, %c0_23] : memref<8x128xbf16, #tpu.memory_space<vmem>>, vector<8x128xbf16>
    tpu.vector_store %arg10[%c0_22, %c0_23], %28 {strides = array<i32>} : memref<8x128xbf16, #tpu.memory_space<vmem>>, vector<8x128xbf16>,
    return
  }
  func.func @transform_0(%arg0: i32) -> (i32, i32) {
    %c0_i32 = arith.constant 0 : i32
    %c0_i32_0 = arith.constant 0 : i32
    return %arg0, %c0_i32 : i32, i32
  }
  func.func @transform_1(%arg0: i32) -> (i32, i32) {
    %c0_i32 = arith.constant 0 : i32
    %c0_i32_0 = arith.constant 0 : i32
    return %arg0, %c0_i32 : i32, i32
  }
  func.func @transform_2(%arg0: i32) -> (i32, i32) {
    %c0_i32 = arith.constant 0 : i32
    %c0_i32_0 = arith.constant 0 : i32
    %c0_i32_1 = arith.constant 0 : i32
    return %c0_i32, %c0_i32_0 : i32, i32
  }
  func.func @transform_3(%arg0: i32) -> (i32, i32) {
    %c0_i32 = arith.constant 0 : i32
    %c0_i32_0 = arith.constant 0 : i32
    %c0_i32_1 = arith.constant 0 : i32
    return %c0_i32, %c0_i32_0 : i32, i32
  }
  func.func @transform_4(%arg0: i32) -> (i32, i32) {
    %c0_i32 = arith.constant 0 : i32
    %c0_i32_0 = arith.constant 0 : i32
    %c0_i32_1 = arith.constant 0 : i32
    return %c0_i32, %c0_i32_0 : i32, i32
  }
  func.func @transform_5(%arg0: i32) -> (i32, i32) {
    %c0_i32 = arith.constant 0 : i32
    %c0_i32_0 = arith.constant 0 : i32
    %c0_i32_1 = arith.constant 0 : i32
    return %c0_i32, %c0_i32_0 : i32, i32
  }
  func.func @transform_6(%arg0: i32) -> (i32, i32) {
    %c0_i32 = arith.constant 0 : i32
    %c0_i32_0 = arith.constant 0 : i32
    %c0_i32_1 = arith.constant 0 : i32
    return %c0_i32, %c0_i32_0 : i32, i32
  }
  func.func @transform_7(%arg0: i32) -> (i32, i32) {
    %c0_i32 = arith.constant 0 : i32
    %c0_i32_0 = arith.constant 0 : i32
    %c0_i32_1 = arith.constant 0 : i32
    return %c0_i32, %c0_i32_0 : i32, i32
  }
  func.func @transform_8(%arg0: i32) -> (i32, i32) {
    %c0_i32 = arith.constant 0 : i32
    %c0_i32_0 = arith.constant 0 : i32
    %c0_i32_1 = arith.constant 0 : i32
    return %c0_i32, %c0_i32_0 : i32, i32
  }
  func.func @transform_9(%arg0: i32) -> (i32, i32) {
    %c0_i32 = arith.constant 0 : i32
    %c0_i32_0 = arith.constant 0 : i32
    return %arg0, %c0_i32 : i32, i32
  }
}

</mosaic_0001>

<bundles_post_ra>
// kernel: tpu_custom_call.1
= control target key start
LH: loop header
LB: loop body
LE: loop exit
PB: predicated region body
PF: predicated region fallthrough
CT: control target
= control target key end

     0   :  { %14 = vsyncpa [#allocation3], 0  ;;  %s992_s0 = inlined_call_operand.hbm [shape: f32[8,32], index: 0, kind: input, shape index: {}]   ;;  %s993_s1 = inlined_call_operand.hbm [shape: f32[8,8], index: 1, kind: input, shape index: {}]   ;;  %s994_s2 = inlined_call_operand.hbm [shape: bf16[32,256], index: 2, kind: input, shape index: {}]   ;;  %s995_s3 = inlined_call_operand.vmem [shape: bf16[8,256], index: 3, kind: input, shape index: {}]   ;;  %s996_s4 = inlined_call_operand.vmem [shape: f32[1,256], index: 4, kind: input, shape index: {}]   ;;  %s997_s5 = inlined_call_operand.hbm [shape: bf16[256,128], index: 5, kind: input, shape index: {}]   ;;  %s998_s6 = inlined_call_operand.vmem [shape: f32[1,128], index: 6, kind: input, shape index: {}]   ;;  %s999_s7 = inlined_call_operand.hbm [shape: bf16[128,128], index: 7, kind: input, shape index: {}]   ;;  %s1000_s8 = inlined_call_operand.vmem [shape: f32[1,128], index: 8, kind: input, shape index: {}]   ;;  %s1001_s9 = inlined_call_operand.hbm [shape: bf16[8,128], index: 9, kind: output, shape index: {}]  }
   0x1   :  { %15 = vsyncpa [#allocation6], 0 }
   0x2   :  { %16 = vsyncpa [#allocation9], 0 }
   0x3   :  { %17 = vsyncpa [#allocation4], 0  ;;  %s825_s30 = smov [#allocation5]   ;;  %s826_s11 = smov [#allocation8]  }
   0x4   :  { %s34_s10 = sshll.u32 %s825_s30, 4  ;;  %s59_s12 = sshll.u32 %s826_s11, 4  ;;  %s35_s10 = int_to_ptr.vmem [resolvable:$true] %s34_s10  ;;  %s888_s12 = int_to_ptr.vmem [resolvable:$true] %s59_s12 }
   0x5   :  { %s685_s15 = scalar_lea.hbm %s993_s1, 128 }
   0x6   :  { %p686_p0 = scmp.ne.s32.totalorder %s993_s1, %s685_s15  ;;  %p689_p1 = scmp.lt.u32.totalorder %s685_s15, %s993_s1 }
   0x8   :  { %p691_p2 = pnand %p689_p1, %p686_p0 }
   0xa   :  { %694 = shalt.err (!%p691_p2)
}
   0xb   :  { %s695_s20 = scalar_lea.vmem %s35_s10, 128  ;;  %p700_p4 = scmp.lt.s32.totalorder %s35_s10, %s35_s10 }
   0xc   :  { %p696_p3 = scmp.ne.s32.totalorder %s35_s10, %s695_s20  ;;  %p701_p5 = scmp.lt.s32.totalorder %s695_s20, %s695_s20 }
   0xe   :  { %p702_p6 = por %p701_p5, %p700_p4 }
  0x10   :  { %p703_p7 = pnand %p702_p6, %p696_p3 }
  0x12   :  { %706 = shalt.err (!%p703_p7)
}
  0x13   :  { %37 = dma.hbm_to_vmem [thread:$0]  %s993_s1, 128, %s35_s10, [#allocation6]  }
  0x14   :  { %s707_s25 = scalar_lea.hbm %s997_s5, 2048 }
  0x15   :  { %p708_p8 = scmp.ne.s32.totalorder %s997_s5, %s707_s25  ;;  %p711_p9 = scmp.lt.u32.totalorder %s707_s25, %s997_s5 }
  0x17   :  { %p713_p10 = pnand %p711_p9, %p708_p8 }
  0x19   :  { %716 = shalt.err (!%p713_p10)
}
  0x1a   :  { %s717_s30 = scalar_lea.vmem %s888_s12, 2048  ;;  %p722_p12 = scmp.lt.s32.totalorder %s888_s12, %s888_s12 }
  0x1b   :  { %p718_p11 = scmp.ne.s32.totalorder %s888_s12, %s717_s30  ;;  %p723_p13 = scmp.lt.s32.totalorder %s717_s30, %s717_s30 }
  0x1d   :  { %p724_p0 = por %p723_p13, %p722_p12 }
  0x1f   :  { %p725_p1 = pnand %p724_p0, %p718_p11 }
  0x21   :  { %728 = shalt.err (!%p725_p1)
}
  0x22   :  { %s827_s1 = smov 64   ;;  %s828_s10 = smov 4  }
  0x23   :  { %65 = dma.hbm_to_vmem [thread:$0]  %s997_s5, 2048, %s888_s12, [#allocation9], %s827_s1, %s827_s1, %s828_s10  }
  0x24   :  { %s829_s14 = smov [#allocation2]   ;;  %s830_s16 = smov [#allocation7]  }
  0x25   :  { %s24_s15 = sshll.u32 %s829_s14, 4  ;;  %s43_s17 = sshll.u32 %s830_s16, 4  ;;  %s25_s15 = int_to_ptr.vmem [resolvable:$true] %s24_s15  ;;  %s922_s17 = int_to_ptr.vmem [resolvable:$true] %s43_s17 }
  0x26   :  { %s729_s20 = scalar_lea.hbm %s992_s0, 128 }
  0x27   :  { %p730_p2 = scmp.ne.s32.totalorder %s992_s0, %s729_s20  ;;  %p733_p3 = scmp.lt.u32.totalorder %s729_s20, %s992_s0 }
  0x29   :  { %p735_p4 = pnand %p733_p3, %p730_p2 }
  0x2b   :  { %738 = shalt.err (!%p735_p4)
}
  0x2c   :  { %s739_s5 = scalar_lea.vmem %s25_s15, 128  ;;  %p744_p6 = scmp.lt.s32.totalorder %s25_s15, %s25_s15 }
  0x2d   :  { %p740_p5 = scmp.ne.s32.totalorder %s25_s15, %s739_s5  ;;  %p745_p7 = scmp.lt.s32.totalorder %s739_s5, %s739_s5 }
  0x2f   :  { %p746_p8 = por %p745_p7, %p744_p6 }
  0x31   :  { %p747_p9 = pnand %p746_p8, %p740_p5 }
  0x33   :  { %750 = shalt.err (!%p747_p9)
}
  0x34   :  { %27 = dma.hbm_to_vmem [thread:$0]  %s992_s0, 128, %s25_s15, [#allocation3]  }
  0x35   :  { %s751_s28 = scalar_lea.hbm %s994_s2, 512 }
  0x36   :  { %p752_p10 = scmp.ne.s32.totalorder %s994_s2, %s751_s28  ;;  %p755_p11 = scmp.lt.u32.totalorder %s751_s28, %s994_s2 }
  0x38   :  { %p757_p12 = pnand %p755_p11, %p752_p10 }
  0x3a   :  { %760 = shalt.err (!%p757_p12)
}
  0x3b   :  { %s761_s14 = scalar_lea.vmem %s922_s17, 512  ;;  %p766_p0 = scmp.lt.s32.totalorder %s922_s17, %s922_s17 }
  0x3c   :  { %p762_p13 = scmp.ne.s32.totalorder %s922_s17, %s761_s14  ;;  %p767_p1 = scmp.lt.s32.totalorder %s761_s14, %s761_s14 }
  0x3e   :  { %p768_p2 = por %p767_p1, %p766_p0 }
  0x40   :  { %p769_p3 = pnand %p768_p2, %p762_p13 }
  0x42   :  { %772 = shalt.err (!%p769_p3)
}
  0x43   :  { %s831_s0 = smov 128   ;;  %s832_s15 = smov 8  }
  0x44   :  { %49 = dma.hbm_to_vmem [thread:$0]  %s994_s2, 512, %s922_s17, [#allocation6], %s831_s0, %s831_s0, %s832_s15  }
  0x45   :  { %s833_s19 = smov [#allocation10]   ;;  %s773_s23 = scalar_lea.hbm %s999_s7, 1024 }
  0x46   :  { %s73_s20 = sshll.u32 %s833_s19, 4  ;;  %p774_p4 = scmp.ne.s32.totalorder %s999_s7, %s773_s23  ;;  %s74_s20 = int_to_ptr.vmem [resolvable:$true] %s73_s20 }
  0x47   :  { %p777_p5 = scmp.lt.u32.totalorder %s773_s23, %s999_s7 }
  0x49   :  { %p779_p6 = pnand %p777_p5, %p774_p4 }
  0x4b   :  { %782 = shalt.err (!%p779_p6)
}
  0x4c   :  { %s783_s26 = scalar_lea.vmem %s74_s20, 1024  ;;  %p788_p8 = scmp.lt.s32.totalorder %s74_s20, %s74_s20 }
  0x4d   :  { %p784_p7 = scmp.ne.s32.totalorder %s74_s20, %s783_s26  ;;  %p789_p9 = scmp.lt.s32.totalorder %s783_s26, %s783_s26 }
  0x4f   :  { %p790_p10 = por %p789_p9, %p788_p8 }
  0x51   :  { %p791_p11 = pnand %p790_p10, %p784_p7 }
  0x53   :  { %794 = shalt.err (!%p791_p11)
}
  0x54   :  { %79 = dma.hbm_to_vmem [thread:$0]  %s999_s7, 1024, %s74_s20, [#allocation9], %s827_s1, %s827_s1, %s828_s10  }
  0x55   :  { %817 = dma.done.wait [#allocation3], 128  }
  0x56   :  { %818 = vsyncadd [#allocation3], 4294967168 }
  0x57   :  { %819 = dma.done.wait [#allocation6], 640  }
  0x58   :  { %820 = vsyncadd [#allocation6], 4294966656 }
  0x59   :  { %821 = dma.done.wait [#allocation9], 3072  }
  0x5a   :  { %822 = vsyncadd [#allocation9], 4294964224  ;;  %v834_v0 = vmov 0   ;;  %v653_v1 = vld [vmem:[#allocation7 + $0x4] ss:$8 sps:$4 sm:$0xff]   ;;  %v106_v2 = vld [vmem:[%s995_s3] sm:$0xff]  ;;  %v231_v36 = vlaneseq }
  0x5b   :  { %155 = vmatprep.mubr.bf16.mxu0 %v834_v0  ;;  %220 = vmatprep.mubr.bf16.mxu1 %v834_v0  ;;  %vm116_vm0 = vcmask 1043456   ;;  %v656_v3 = vld [vmem:[#allocation7] ss:$8 sps:$4 sm:$0xff]   ;;  %v555_v4 = vcombine.high %v106_v2, %v106_v2  ;;  %v554_v5 = vcombine.low %v106_v2, %v106_v2  ;;  %v658_v6 = vld [vmem:[#allocation7 + $0x14] ss:$8 sps:$4 sm:$0xff]   ;;  %vm112_vm1 = vcmask 64512  }
  0x5c   :  { %188 = vmatprep.subr.bf16.mxu1 %v653_v1  ;;  %v100_v7 = vld [vmem:[#allocation5] sm:$0xff]  ;;  %v98_v9 = vld [vmem:[#allocation2] sm:$0xff]  ;;  %v661_v12 = vld [vmem:[#allocation8 + $0x40] sm:$0xff]   ;;  %vm184_vm2 = vcmask 261120   ;;  %v835_v30 = vmov 0.0   ;;  %v232_v37 = vshrl.u32 %v231_v36, 7 }
  0x5d   :  { %189 = vmatpush1.bf16.msra.mxu1 %v656_v3  ;;  %v660_v8 = vld [vmem:[#allocation7 + $0x10] ss:$8 sps:$4 sm:$0xff]   ;;  %556 = vmatprep.subr.msk.bf16.mxu0 %vm116_vm0, %v555_v4  ;;  %v118_v10 = vsel %vm116_vm0, %v554_v5, 0  ;;  %v101_v11 = vpack.c.bf16 %v100_v7, %v100_v7  ;;  %v662_v13 = vld [vmem:[#allocation8] sm:$0xff]   ;;  %v99_v14 = vpack.c.bf16 %v98_v9, %v98_v9  ;;  %v663_v15 = vld [vmem:[#allocation8 + $0x48] sm:$0xff]   ;;  %vm836_vm3 = vmmov 0  }
  0x5e   :  { %190 = vmatprep.subr.bf16.mxu1 %v658_v6  ;;  %124 = vmatpush1.bf16.msra.mxu0 %v118_v10  ;;  %v664_v16 = vld [vmem:[#allocation8 + $0x8] sm:$0xff]   ;;  %v665_v17 = vld [vmem:[#allocation8 + $0x50] sm:$0xff]   ;;  %v667_v19 = vld [vmem:[#allocation8 + $0x58] sm:$0xff]   ;;  %v233_v38 = vsub.s32 0, %v232_v37  ;;  %v237_v40 = vsub.s32 1, %v232_v37  ;;  %s837_s30 = smov [#allocation11]  }
  0x5f   :  { %589 = vmatprep.subr.bf16.mxu0 %v661_v12  ;;  %v666_v18 = vld [vmem:[#allocation8 + $0x10] sm:$0xff]   ;;  %v668_v20 = vld [vmem:[#allocation8 + $0x18] sm:$0xff]   ;;  %v669_v21 = vld [vmem:[#allocation8 + $0x60] sm:$0xff]   ;;  %s543_s11 = sshll.u32 %s837_s30, 4  ;;  %s544_s11 = int_to_ptr.vmem [resolvable:$true] %s543_s11 }
  0x60   :  { %v670_v22 = vld [vmem:[#allocation8 + $0x20] sm:$0xff]   ;;  %v671_v23 = vld [vmem:[#allocation8 + $0x68] sm:$0xff]   ;;  %v673_v25 = vld [vmem:[#allocation8 + $0x70] sm:$0xff]   ;;  %p800_p13 = scmp.lt.s32.totalorder %s544_s11, %s544_s11 }
  0x61   :  { %191 = vmatpush1.bf16.msra.mxu1 %v660_v8  ;;  %557 = vmatmul.mubr.msk.bf16.vlgmr.msra.gmra.mrb[0].mxu0 %vm112_vm1, %v101_v11  ;;  %v672_v24 = vld [vmem:[#allocation8 + $0x28] sm:$0xff]   ;;  %v674_v26 = vld [vmem:[#allocation8 + $0x30] sm:$0xff]   ;;  %v675_v27 = vld [vmem:[#allocation8 + $0x78] sm:$0xff]  }
  0x62   :  { %590 = vmatpush3.bf16.msra.mxu0 %v662_v13  ;;  %v676_v28 = vld [vmem:[#allocation8 + $0x38] sm:$0xff]   ;;  %v677_v29 = vld [vmem:[#allocation10] sm:$0xff]   ;;  %620 = vmatprep.subr.bf16.mxu1 %v835_v30  ;;  %v678_v31 = vld [vmem:[#allocation10 + $0x8] sm:$0xff]  }
  0x63   :  { %591 = vmatprep.subr.bf16.mxu0 %v663_v15  ;;  %v679_v32 = vld [vmem:[#allocation10 + $0x10] sm:$0xff]   ;;  %v680_v33 = vld [vmem:[#allocation10 + $0x18] sm:$0xff]   ;;  %v681_v34 = vld [vmem:[#allocation10 + $0x20] sm:$0xff]  }
  0x64   :  { %562 = vmatmul.mubr.msk.bf16.vlgmr.msra.gmra.mrb[0].mxu1 %vm184_vm2, %v99_v14  ;;  %v682_v35 = vld [vmem:[#allocation10 + $0x28] sm:$0xff]   ;;  %v229_v39 = vld [vmem:[%s996_s4] sm:$0x3]  ;;  %v684_v60 = vld [vmem:[#allocation10 + $0x38] sm:$0xff]  }
  0x65   :  { %621 = vmatpush3.bf16.msra.mxu1 %v677_v29  ;;  %v234_v43 = vrot.slane %v229_v39, %v233_v38  ;;  %v238_v46 = vrot.slane %v229_v39, %v237_v40  ;;  %v683_v59 = vld [vmem:[#allocation10 + $0x30] sm:$0xff]   ;;  %636 = vmatprep.mubr.msk.bf16.mxu1 %vm836_vm3, %v835_v30 }
  0x66   :  { %592 = vmatpush3.bf16.msra.mxu0 %v664_v16  ;;  %622 = vmatprep.subr.bf16.mxu1 %v835_v30  ;;  %v563_v62 = vld [vmem:[%s998_s6] ss:$0 sm:$0xff]  ;;  %s795_s6 = scalar_lea.vmem %s544_s11, 64 }
  0x67   :  { %593 = vmatprep.subr.bf16.mxu0 %v665_v17  ;;  %v580_v6 = vld [vmem:[%s1000_s8] ss:$0 sm:$0xff]  ;;  %p796_p12 = scmp.ne.s32.totalorder %s544_s11, %s795_s6  ;;  %p801_p0 = scmp.lt.s32.totalorder %s795_s6, %s795_s6 }
  0x69   :  { %623 = vmatpush3.bf16.msra.mxu1 %v678_v31  ;;  %p802_p1 = por %p801_p0, %p800_p13 }
  0x6a   :  { %594 = vmatpush3.bf16.msra.mxu0 %v666_v18  ;;  %624 = vmatprep.subr.bf16.mxu1 %v835_v30 }
  0x6b   :  { %595 = vmatprep.subr.bf16.mxu0 %v667_v19  ;;  %p803_p2 = pnand %p802_p1, %p796_p12 }
  0x6d   :  { %625 = vmatpush3.bf16.msra.mxu1 %v679_v32 }
  0x6e   :  { %596 = vmatpush3.bf16.msra.mxu0 %v668_v20  ;;  %626 = vmatprep.subr.bf16.mxu1 %v835_v30 }
  0x6f   :  { %597 = vmatprep.subr.bf16.mxu0 %v669_v21 }
  0x71   :  { %627 = vmatpush3.bf16.msra.mxu1 %v680_v33 }
  0x72   :  { %598 = vmatpush3.bf16.msra.mxu0 %v670_v22  ;;  %628 = vmatprep.subr.bf16.mxu1 %v835_v30 }
  0x73   :  { %599 = vmatprep.subr.bf16.mxu0 %v671_v23 }
  0x75   :  { %629 = vmatpush3.bf16.msra.mxu1 %v681_v34 }
  0x76   :  { %600 = vmatpush3.bf16.msra.mxu0 %v672_v24  ;;  %630 = vmatprep.subr.bf16.mxu1 %v835_v30 }
  0x77   :  { %601 = vmatprep.subr.bf16.mxu0 %v673_v25 }
  0x79   :  { %631 = vmatpush3.bf16.msra.mxu1 %v682_v35 }
  0x7a   :  { %602 = vmatpush3.bf16.msra.mxu0 %v674_v26  ;;  %632 = vmatprep.subr.bf16.mxu1 %v835_v30 }
  0x7b   :  { %603 = vmatprep.subr.bf16.mxu0 %v675_v27 }
  0x7d   :  { %633 = vmatpush3.bf16.msra.mxu1 %v683_v59 }
  0x7e   :  { %604 = vmatpush3.bf16.msra.mxu0 %v676_v28  ;;  %634 = vmatprep.subr.bf16.mxu1 %v835_v30 }
  0x81   :  { %635 = vmatpush3.bf16.msra.mxu1 %v684_v60 }
 0x134   :  { %v157_v41 = vpop.f32.mrb[0].mxu0 }
 0x135   :  { %v159_v42 = vpop.f32.mrb[1].mxu0 }
 0x136   :  { %v161_v44 = vpop.f32.mrb[2].mxu0 }
 0x137   :  { %v222_v45 = vpop.f32.mrb[0].mxu1  ;;  %v162_v47 = vpop.f32.mrb[3].mxu0 }
 0x138   :  { %v223_v48 = vadd.f32 %v222_v45, %v157_v41  ;;  %v224_v49 = vpop.f32.mrb[1].mxu1 }
 0x139   :  { %v225_v50 = vadd.f32 %v224_v49, %v159_v42  ;;  %v226_v51 = vpop.f32.mrb[2].mxu1 }
 0x13a   :  { %v241_v52 = vadd.f32 %v234_v43, %v223_v48  ;;  %v227_v53 = vpop.f32.mrb[3].mxu1 }
 0x13b   :  { %v242_v54 = vadd.f32 %v238_v46, %v225_v50 }
 0x13c   :  { %v243_v55 = vmax.f32 %v241_v52, 0.0 }
 0x13d   :  { %v244_v56 = vmax.f32 %v242_v54, 0.0 }
 0x13e   :  { %v245_v58 = vpack.c.bf16 %v243_v55, %v243_v55 }
 0x13f   :  { %v246_v57 = vpack.c.bf16 %v244_v56, %v244_v56 }
 0x141   :  { %414 = vmatprep.mubr.bf16.mxu0 %v246_v57 }
 0x142   :  { %415 = vmatmul.mubr.bf16.vlgmr.msra.gmra.mrb[4].mxu0 %v245_v58 }
 0x215   :  { %v605_v61 = vpop.f32.mrb[4].mxu0 }
 0x216   :  { %v606_v63 = vpop.f32.mrb[5].mxu0 }
 0x217   :  { %v607_v0 = vadd.f32 %v606_v63, %v605_v61  ;;  %v608_v1 = vpop.f32.mrb[6].mxu0 }
 0x218   :  { %v609_v2 = vpop.f32.mrb[7].mxu0 }
 0x219   :  { %v417_v3 = vadd.f32 %v607_v0, %v563_v62 }
 0x21b   :  { %v422_v4 = vmax.f32 %v417_v3, 0.0 }
 0x21d   :  { %v423_v5 = vpack.c.bf16 %v422_v4, %v422_v4 }
 0x21f   :  { %637 = vmatmul.mubr.bf16.vlgmr.msra.gmra.mrb[4].mxu1 %v423_v5 }
 0x2f2   :  { %v529_v7 = vpop.f32.mrb[4].mxu1 }
 0x2f3   :  { %v530_v8 = vadd.f32 %v580_v6, %v529_v7  ;;  %v638_v9 = vpop.f32.mrb[5].mxu1 }
 0x2f4   :  { %v532_v10 = vpop.f32.mrb[6].mxu1 }
 0x2f5   :  { %v535_v11 = vpack.c.bf16 %v530_v8, %v530_v8  ;;  %v639_v12 = vpop.f32.mrb[7].mxu1 }
 0x2f7   :  { %536 = vst [vmem:[#allocation11] sm:$0xf] %v535_v11 }
 0x2f8   :  { %806 = shalt.err (!%p803_p2)
}
 0x2f9   :  { %s807_s8 = scalar_lea.hbm %s1001_s9, 64 }
 0x2fa   :  { %p808_p3 = scmp.ne.s32.totalorder %s1001_s9, %s807_s8  ;;  %p811_p4 = scmp.lt.u32.totalorder %s807_s8, %s1001_s9 }
 0x2fc   :  { %p813_p5 = pnand %p811_p4, %p808_p3 }
 0x2fe   :  { %816 = shalt.err (!%p813_p5)
}
 0x2ff   :  { %546 = dma.vmem_to_hbm [thread:$0]  %s544_s11, 64, %s1001_s9, [#allocation4]  }
 0x300   :  { %823 = dma.done.wait [#allocation4], 64  }
 0x301   :  { %824 = vsyncadd [#allocation4], 4294967232 }
 0x302   :  { %550 = vsyncpa [#allocation3], 1 }
 0x303   :  { %551 = vsyncpa [#allocation6], 1 }
 0x304   :  { %552 = vsyncpa [#allocation9], 1 }
 0x305   :  { %553 = vsyncpa [#allocation4], 1 }

</bundles_post_ra>
